<compile_context>
chip_gen: v5e
topology: v5e:2x2
jax: 0.10.0
libtpu: 0.0.40
codegen_flags: <defaults>
</compile_context>

<pallas_src>
import functools

import jax
import jax.numpy as jnp
from jax.experimental import pallas as pl
from jax.experimental.pallas import tpu as pltpu


_SUBLANE = 8
# Single-block cap: at 8192 rows the x/out tiles (double-buffered) plus the
# [rows, 24] f32 intermediates total ~3 MB, well under v5e's 16 MiB scoped-VMEM
# default (and v7x's 32 MiB scoped / 64 MiB physical VMEM).
_MAX_BLOCK_ROWS = 8192


def dqn_kernel(x_ref, w1_ref, b1_ref, w2_ref, b2_ref, w3_ref, b3_ref, o_ref):
    # x_ref: [bb, state_dim] (natural layout; batch on sublanes)
    # Wi:    [out, in]  (PyTorch nn.Linear layout)   bi: [1, out]
    # Every layer contracts on the feature axis (NT matmul, MXU-native),
    # accumulating in f32; ReLU on the VPU.
    nt = (((1,), (1,)), ((), ()))
    h1 = jax.lax.dot_general(x_ref[...], w1_ref[...], nt,
                             preferred_element_type=jnp.float32) + b1_ref[...]
    h1 = jnp.maximum(h1, 0.0)
    h2 = jax.lax.dot_general(h1, w2_ref[...], nt,
                             preferred_element_type=jnp.float32) + b2_ref[...]
    h2 = jnp.maximum(h2, 0.0)
    q = jax.lax.dot_general(h2, w3_ref[...], nt,
                            preferred_element_type=jnp.float32) + b3_ref[...]
    o_ref[...] = q.astype(o_ref.dtype)


def _round_up(n, m):
    return -(-n // m) * m


@functools.lru_cache(maxsize=1)
def _tensorcores_per_chip():
    # v7x exposes 2 TensorCores per chip; v5e/v6e have 1. Guarded so any
    # unexpected device string just falls back to the single-block policy.
    try:
        kind = jax.devices()[0].device_kind.lower()
    except Exception:
        return 1
    return 2 if ("7x" in kind or "v7" in kind) else 1


@jax.jit
def dqn_forward(x, w1, b1, w2, b2, w3, b3):
    """x: [batch, state_dim]; Wi: [out, in]; bi: [out]. Returns [batch, action_dim] f32."""
    batch, state_dim = x.shape
    hidden = w1.shape[0]
    action_dim = w3.shape[0]

    # Grid policy (all trace-time Python on static shapes):
    #   * pad batch only to the 8-row sublane granularity,
    #   * one block on single-TC chips (each extra grid step is ~0.35 us of pure
    #     overhead on a tile that takes far less than that to DMA/compute),
    #   * two blocks on v7x when there's enough work, so the "parallel" axis
    #     shards one block per TensorCore,
    #   * cap block rows to stay VMEM-safe for very large inference batches.
    padded = _round_up(batch, _SUBLANE)
    n_blocks = 2 if (_tensorcores_per_chip() == 2 and padded >= 256) else 1
    n_blocks = max(n_blocks, pl.cdiv(padded, _MAX_BLOCK_ROWS))
    bb = _round_up(pl.cdiv(padded, n_blocks), _SUBLANE)
    padded = bb * n_blocks

    x_p = x if padded == batch else jnp.pad(x, ((0, padded - batch), (0, 0)))

    resident = lambda i: (0, 0)   # weights/biases keep the same block every step

    q = pl.pallas_call(
        dqn_kernel,
        out_shape=jax.ShapeDtypeStruct((padded, action_dim), jnp.float32),
        grid=(n_blocks,),
        in_specs=[
            pl.BlockSpec((bb, state_dim), lambda i: (i, 0)),   # x tile
            pl.BlockSpec((hidden, state_dim), resident),       # W1
            pl.BlockSpec((1, hidden), resident),               # b1
            pl.BlockSpec((hidden, hidden), resident),          # W2
            pl.BlockSpec((1, hidden), resident),               # b2
            pl.BlockSpec((action_dim, hidden), resident),      # W3
            pl.BlockSpec((1, action_dim), resident),           # b3
        ],
        out_specs=pl.BlockSpec((bb, action_dim), lambda i: (i, 0)),
        compiler_params=pltpu.CompilerParams(
            dimension_semantics=("parallel",),   # batch blocks shard across v7x TCs
        ),
    )(
        x_p.astype(jnp.float32),
        w1.astype(jnp.float32), b1.reshape(1, hidden).astype(jnp.float32),
        w2.astype(jnp.float32), b2.reshape(1, hidden).astype(jnp.float32),
        w3.astype(jnp.float32), b3.reshape(1, action_dim).astype(jnp.float32),
    )

    return q[:batch] if padded != batch else q


def init_dqn_params(key, state_dim, action_dim, hidden=24, dtype=jnp.float32):
    """PyTorch nn.Linear default init: U(-1/sqrt(fan_in), +1/sqrt(fan_in)).
    Weights stored [out, in] (PyTorch layout); biases stored [out]."""
    def linear(k, fan_in, fan_out):
        kw, kb = jax.random.split(k)
        bound = 1.0 / float(fan_in) ** 0.5
        w = jax.random.uniform(kw, (fan_out, fan_in), dtype, -bound, bound)
        b = jax.random.uniform(kb, (fan_out,), dtype, -bound, bound)
        return w, b

    k1, k2, k3 = jax.random.split(key, 3)
    w1, b1 = linear(k1, state_dim, hidden)
    w2, b2 = linear(k2, hidden, hidden)
    w3, b3 = linear(k3, hidden, action_dim)
    return w1, b1, w2, b2, w3, b3


def dqn_reference(x, w1, b1, w2, b2, w3, b3):
    h1 = jnp.maximum(x @ w1.T + b1, 0.0)
    h2 = jnp.maximum(h1 @ w2.T + b2, 0.0)
    return h2 @ w3.T + b3


if __name__ == "__main__":
    # Shapes consistent with the DQN module: state_dim=8, action_dim=4, hidden=24.
    state_dim, action_dim = 8, 4

    key = jax.random.PRNGKey(0)
    k_params, k_x1, k_x2 = jax.random.split(key, 3)
    params = init_dqn_params(k_params, state_dim, action_dim)

    # Small batch: single block, no padding needed (16 is a multiple of 8).
    x_small = jax.random.normal(k_x1, (16, state_dim), dtype=jnp.float32)
    out_small = jax.block_until_ready(dqn_forward(x_small, *params))
    ref_small = dqn_reference(x_small, *params)
    assert out_small.shape == (16, action_dim)
    assert jnp.allclose(out_small, ref_small, atol=2e-3, rtol=2e-3), "small-batch mismatch"

    # Ragged replay-size batch: exercises 8-row padding (333 -> 336) and, on
    # v7x, the two-block megacore path; single block elsewhere.
    x_big = jax.random.normal(k_x2, (333, state_dim), dtype=jnp.float32)
    out_big = jax.block_until_ready(dqn_forward(x_big, *params))
    ref_big = dqn_reference(x_big, *params)
    assert out_big.shape == (333, action_dim)
    assert jnp.allclose(out_big, ref_big, atol=2e-3, rtol=2e-3), "big-batch mismatch"

    print("KERNEL_OK")
</pallas_src>

<mosaic_0001>
module attributes {stable_mosaic.version = 11 : i64} {
  func.func @dqn_kernel(%arg0: i32, %arg1: memref<16x8xf32, #tpu.memory_space<vmem>>, %arg2: memref<24x8xf32, #tpu.memory_space<vmem>>, %arg3: memref<1x24xf32, #tpu.memory_space<vmem>>, %arg4: memref<24x24xf32, #tpu.memory_space<vmem>>, %arg5: memref<1x24xf32, #tpu.memory_space<vmem>>, %arg6: memref<4x24xf32, #tpu.memory_space<vmem>>, %arg7: memref<1x4xf32, #tpu.memory_space<vmem>>, %arg8: memref<16x4xf32, #tpu.memory_space<vmem>>) attributes {dimension_semantics = [#tpu.dimension_semantics<parallel>], iteration_bounds = array<i64: 1>, scalar_prefetch = 0 : i64, scratch_operands = 0 : i64, tpu.core_type = #tpu.core_type<tc>, window_params = [{transform_indices = @transform_0, window_bounds = array<i64: 16, 8>}, {pipeline_mode = #tpu.pipeline_mode<synchronous>, transform_indices = @transform_1, window_bounds = array<i64: 24, 8>}, {pipeline_mode = #tpu.pipeline_mode<synchronous>, transform_indices = @transform_2, window_bounds = array<i64: 1, 24>}, {pipeline_mode = #tpu.pipeline_mode<synchronous>, transform_indices = @transform_3, window_bounds = array<i64: 24, 24>}, {pipeline_mode = #tpu.pipeline_mode<synchronous>, transform_indices = @transform_4, window_bounds = array<i64: 1, 24>}, {pipeline_mode = #tpu.pipeline_mode<synchronous>, transform_indices = @transform_5, window_bounds = array<i64: 4, 24>}, {pipeline_mode = #tpu.pipeline_mode<synchronous>, transform_indices = @transform_6, window_bounds = array<i64: 1, 4>}, {transform_indices = @transform_7, window_bounds = array<i64: 16, 4>}]} {
    %c0 = arith.constant 0 : index
    %c0_0 = arith.constant 0 : index
    %0 = vector.load %arg1[%c0, %c0_0] : memref<16x8xf32, #tpu.memory_space<vmem>>, vector<16x8xf32>
    %c0_1 = arith.constant 0 : index
    %c0_2 = arith.constant 0 : index
    %1 = vector.load %arg2[%c0_1, %c0_2] : memref<24x8xf32, #tpu.memory_space<vmem>>, vector<24x8xf32>
    %cst = arith.constant dense<0.000000e+00> : vector<16x24xf32>
    %2 = tpu.matmul %0, %1, %cst {dimension_numbers = #tpu.dot_dimension_numbers<[1], [1], [0], [0], [0, 0, 1, 0], [], []>} : vector<16x8xf32>, vector<24x8xf32>, vector<16x24xf32> -> vector<16x24xf32>
    %c0_3 = arith.constant 0 : index
    %c0_4 = arith.constant 0 : index
    %3 = vector.load %arg3[%c0_3, %c0_4] : memref<1x24xf32, #tpu.memory_space<vmem>>, vector<1x24xf32>
    %4 = vector.broadcast %3 : vector<1x24xf32> to vector<16x24xf32>
    %5 = arith.addf %2, %4 : vector<16x24xf32>
    %cst_5 = arith.constant 0.000000e+00 : f32
    %6 = vector.broadcast %cst_5 : f32 to vector<16x24xf32>
    %7 = arith.maximumf %5, %6 : vector<16x24xf32>
    %c0_6 = arith.constant 0 : index
    %c0_7 = arith.constant 0 : index
    %8 = vector.load %arg4[%c0_6, %c0_7] : memref<24x24xf32, #tpu.memory_space<vmem>>, vector<24x24xf32>
    %cst_8 = arith.constant dense<0.000000e+00> : vector<16x24xf32>
    %9 = tpu.matmul %7, %8, %cst_8 {dimension_numbers = #tpu.dot_dimension_numbers<[1], [1], [0], [0], [0, 0, 1, 0], [], []>} : vector<16x24xf32>, vector<24x24xf32>, vector<16x24xf32> -> vector<16x24xf32>
    %c0_9 = arith.constant 0 : index
    %c0_10 = arith.constant 0 : index
    %10 = vector.load %arg5[%c0_9, %c0_10] : memref<1x24xf32, #tpu.memory_space<vmem>>, vector<1x24xf32>
    %11 = vector.broadcast %10 : vector<1x24xf32> to vector<16x24xf32>
    %12 = arith.addf %9, %11 : vector<16x24xf32>
    %cst_11 = arith.constant 0.000000e+00 : f32
    %13 = vector.broadcast %cst_11 : f32 to vector<16x24xf32>
    %14 = arith.maximumf %12, %13 : vector<16x24xf32>
    %c0_12 = arith.constant 0 : index
    %c0_13 = arith.constant 0 : index
    %15 = vector.load %arg6[%c0_12, %c0_13] : memref<4x24xf32, #tpu.memory_space<vmem>>, vector<4x24xf32>
    %cst_14 = arith.constant dense<0.000000e+00> : vector<16x4xf32>
    %16 = tpu.matmul %14, %15, %cst_14 {dimension_numbers = #tpu.dot_dimension_numbers<[1], [1], [0], [0], [0, 0, 1, 0], [], []>} : vector<16x24xf32>, vector<4x24xf32>, vector<16x4xf32> -> vector<16x4xf32>
    %c0_15 = arith.constant 0 : index
    %c0_16 = arith.constant 0 : index
    %17 = vector.load %arg7[%c0_15, %c0_16] : memref<1x4xf32, #tpu.memory_space<vmem>>, vector<1x4xf32>
    %18 = vector.broadcast %17 : vector<1x4xf32> to vector<16x4xf32>
    %19 = arith.addf %16, %18 : vector<16x4xf32>
    %c0_17 = arith.constant 0 : index
    %c0_18 = arith.constant 0 : index
    %20 = vector.load %arg8[%c0_17, %c0_18] : memref<16x4xf32, #tpu.memory_space<vmem>>, vector<16x4xf32>
    tpu.vector_store %arg8[%c0_17, %c0_18], %19 {strides = array<i32>} : memref<16x4xf32, #tpu.memory_space<vmem>>, vector<16x4xf32>,
    return
  }
  func.func @transform_0(%arg0: i32) -> (i32, i32) {
    %c0_i32 = arith.constant 0 : i32
    %c0_i32_0 = arith.constant 0 : i32
    return %arg0, %c0_i32 : i32, i32
  }
  func.func @transform_1(%arg0: i32) -> (i32, i32) {
    %c0_i32 = arith.constant 0 : i32
    %c0_i32_0 = arith.constant 0 : i32
    %c0_i32_1 = arith.constant 0 : i32
    return %c0_i32, %c0_i32_0 : i32, i32
  }
  func.func @transform_2(%arg0: i32) -> (i32, i32) {
    %c0_i32 = arith.constant 0 : i32
    %c0_i32_0 = arith.constant 0 : i32
    %c0_i32_1 = arith.constant 0 : i32
    return %c0_i32, %c0_i32_0 : i32, i32
  }
  func.func @transform_3(%arg0: i32) -> (i32, i32) {
    %c0_i32 = arith.constant 0 : i32
    %c0_i32_0 = arith.constant 0 : i32
    %c0_i32_1 = arith.constant 0 : i32
    return %c0_i32, %c0_i32_0 : i32, i32
  }
  func.func @transform_4(%arg0: i32) -> (i32, i32) {
    %c0_i32 = arith.constant 0 : i32
    %c0_i32_0 = arith.constant 0 : i32
    %c0_i32_1 = arith.constant 0 : i32
    return %c0_i32, %c0_i32_0 : i32, i32
  }
  func.func @transform_5(%arg0: i32) -> (i32, i32) {
    %c0_i32 = arith.constant 0 : i32
    %c0_i32_0 = arith.constant 0 : i32
    %c0_i32_1 = arith.constant 0 : i32
    return %c0_i32, %c0_i32_0 : i32, i32
  }
  func.func @transform_6(%arg0: i32) -> (i32, i32) {
    %c0_i32 = arith.constant 0 : i32
    %c0_i32_0 = arith.constant 0 : i32
    %c0_i32_1 = arith.constant 0 : i32
    return %c0_i32, %c0_i32_0 : i32, i32
  }
  func.func @transform_7(%arg0: i32) -> (i32, i32) {
    %c0_i32 = arith.constant 0 : i32
    %c0_i32_0 = arith.constant 0 : i32
    return %arg0, %c0_i32 : i32, i32
  }
}

</mosaic_0001>

<bundles_post_ra>
// kernel: dqn_forward.1
= control target key start
LH: loop header
LB: loop body
LE: loop exit
PB: predicated region body
PF: predicated region fallthrough
CT: control target
= control target key end

     0   :  { %vm35_vm0 = vcmask 64512   ;;  %vm83_vm1 = vcmask 195584   ;;  %vm161_vm2 = vcmask 31744   ;;  %s285_s1 = inlined_call_operand.vmem [shape: f32[24,8], index: 1, kind: input, shape index: {}]   ;;  %s286_s3 = inlined_call_operand.vmem [shape: f32[24,24], index: 3, kind: input, shape index: {}]   ;;  %s287_s2 = inlined_call_operand.vmem [shape: f32[1,24], index: 2, kind: input, shape index: {}]   ;;  %s288_s0 = inlined_call_operand.vmem [shape: f32[16,8], index: 0, kind: input, shape index: {}]   ;;  %s289_s4 = inlined_call_operand.vmem [shape: f32[1,24], index: 4, kind: input, shape index: {}]   ;;  %s290_s6 = inlined_call_operand.vmem [shape: f32[1,4], index: 6, kind: input, shape index: {}]   ;;  %s291_s5 = inlined_call_operand.vmem [shape: f32[4,24], index: 5, kind: input, shape index: {}]   ;;  %s292_s7 = inlined_call_operand.vmem [shape: f32[16,4], index: 7, kind: output, shape index: {}]  }
   0x1   :  { %v30_v0 = vld [vmem:[%s285_s1 + $0x10] sm:$0xff]  ;;  %v29_v2 = vld [vmem:[%s285_s1 + $0x8] sm:$0xff]  ;;  %v28_v4 = vld [vmem:[%s285_s1] sm:$0xff] }
   0x2   :  { %168 = vmatpush.xpose.msk.msra.mxu0 %vm35_vm0, %v30_v0  ;;  %181 = vmatpush.xpose.msk.msra.mxu3 %vm35_vm0, %v30_v0  ;;  %v78_v1 = vld [vmem:[%s286_s3 + $0x10] sm:$0xff]  ;;  %v77_v3 = vld [vmem:[%s286_s3 + $0x8] sm:$0xff]  ;;  %v26_v5 = vld [vmem:[%s288_s0] sm:$0xff] }
   0x3   :  { %173 = vmatpush.xpose.msk.msra.mxu1 %vm83_vm1, %v78_v1  ;;  %v27_v6 = vld [vmem:[%s288_s0 + $0x8] sm:$0xff]  ;;  %v76_v7 = vld [vmem:[%s286_s3] sm:$0xff] }
   0x4   :  { %v184_v8 = vld [vmem:[%s287_s2] ss:$0 sm:$0xff] }
   0x5   :  { %v124_v15 = vld [vmem:[%s291_s5] sm:$0xf] }
   0x6   :  { %169 = vmatpush.xpose.msk.msra.mxu0 %vm35_vm0, %v29_v2  ;;  %182 = vmatpush.xpose.msk.msra.mxu3 %vm35_vm0, %v29_v2  ;;  %v185_v16 = vld [vmem:[%s289_s4] ss:$0 sm:$0xff] }
   0x7   :  { %174 = vmatpush.xpose.msk.msra.mxu1 %vm83_vm1, %v77_v3  ;;  %178 = vmatpush.xpose.msk.msra.mxu2 %vm83_vm1, %v124_v15  ;;  %v186_v23 = vld [vmem:[%s290_s6] ss:$0 sm:$0xff] }
   0xa   :  { %170 = vmatpush.xpose.msk.msra.mxu0 %vm35_vm0, %v28_v4  ;;  %183 = vmatpush.xpose.msk.msra.mxu3 %vm35_vm0, %v28_v4 }
   0xb   :  { %175 = vmatpush.xpose.msk.msra.mxu1 %vm83_vm1, %v76_v7 }
   0xd   :  { %171 = vmatmul.msk.f32.vlgmr.msra.gmra.mxu0 %vm35_vm0, %v26_v5  ;;  %172 = vmatmul.msk.f32.vlgmr.msra.gmra.mxu3 %vm35_vm0, %v27_v6 }
  0x8a   :  { %v68_v9 = vpop.f32.mrf.mxu0 }
  0x8b   :  { %v69_v10 = vadd.f32 %v184_v8, %v68_v9 }
  0x8d   :  { %v74_v11 = vmax.f32 %v69_v10, 0.0 }
  0x8f   :  { %176 = vmatmul.msk.f32.vlgmr.msra.gmra.mxu1 %vm83_vm1, %v74_v11 }
  0x90   :  { %v71_v12 = vpop.f32.mrf.mxu3 }
  0x91   :  { %v72_v13 = vadd.f32 %v184_v8, %v71_v12 }
  0x93   :  { %v75_v14 = vmax.f32 %v72_v13, 0.0 }
  0x97   :  { %177 = vmatmul.msk.f32.gmra.mxu1 %vm83_vm1, %v75_v14 }
 0x10c   :  { %v116_v17 = vpop.f32.mrf.mxu1 }
 0x10d   :  { %v117_v18 = vadd.f32 %v185_v16, %v116_v17 }
 0x10f   :  { %v122_v19 = vmax.f32 %v117_v18, 0.0 }
 0x111   :  { %179 = vmatmul.msk.f32.vlgmr.msra.gmra.mxu2 %vm83_vm1, %v122_v19 }
 0x114   :  { %v119_v20 = vpop.f32.mrf.mxu1 }
 0x115   :  { %v120_v21 = vadd.f32 %v185_v16, %v119_v20 }
 0x117   :  { %v123_v22 = vmax.f32 %v120_v21, 0.0 }
 0x119   :  { %180 = vmatmul.msk.f32.gmra.mxu2 %vm83_vm1, %v123_v22 }
 0x194   :  { %v155_v24 = vpop.f32.mrf.mxu2 }
 0x195   :  { %v156_v25 = vadd.f32 %v186_v23, %v155_v24 }
 0x197   :  { %162 = vst.msk [vmem:[%s292_s7] sm:$0xff] %vm161_vm2, %v156_v25 }
 0x19c   :  { %v158_v26 = vpop.f32.mrf.mxu2 }
 0x19d   :  { %v159_v27 = vadd.f32 %v186_v23, %v158_v26 }
 0x19f   :  { %163 = vst.msk [vmem:[%s292_s7 + $0x8] sm:$0xff] %vm161_vm2, %v159_v27 }

</bundles_post_ra>
